<compile_context>
chip_gen: v7x
topology: tpu7x:2x2x1
jax: 0.10.0
libtpu: 0.0.40
codegen_flags: <defaults>
</compile_context>

<pallas_src>
import numpy as np
import jax
import jax.numpy as jnp
from jax.experimental import pallas as pl
from jax.experimental.pallas import tpu as pltpu


def onehot_kernel(q_ref, m_ref, v_ref, o_ref):
    # q_ref : (TB, QT), m_ref : (QT, TV), v_ref/o_ref : (TB, TV)
    q = q_ref[...]
    if q.dtype != jnp.float32:          # trace-time; no-op cast avoided when f32
        q = q.astype(jnp.float32)

    # Numerically-stable softmax numerator; normalization is folded in after the
    # matmul (denom is a per-row scalar, so softmax(q) @ M == (exp_q @ M) / denom).
    q = q - jnp.max(q, axis=-1, keepdims=True)
    e = jnp.exp(q)
    inv_denom = pl.reciprocal(jnp.sum(e, axis=-1, keepdims=True), approx=True)

    # (TB, QT) @ (QT, TV) on the MXU (K=QT is tiny; the kernel is HBM bound on
    # the (TB, TV) streams, so this is essentially free).
    proj = jnp.dot(e, m_ref[...], preferred_element_type=jnp.float32)

    o_ref[...] = (proj * inv_denom * v_ref[...]).astype(o_ref.dtype)


def _pick_tile(dim, max_tile, align):
    """Largest tile <= max_tile that is either the full dim or a multiple of align."""
    if dim <= max_tile:
        return dim
    return max(align, (max_tile // align) * align)


def onehot_layer(question_type_output, question_type_matrix, vqa_output,
                 *, tb=None, tv=None, vmem_limit_bytes=None):
    B, QT = question_type_output.shape
    QT2, V = question_type_matrix.shape
    assert QT == QT2 and vqa_output.shape == (B, V)

    # Tile sizes: lane-dense on the vocab axis (multiple of 128, up to 2048),
    # batch tiles a multiple of 8 (up to 256). Sized so double-buffered tiles fit
    # comfortably inside v7x's 64 MiB VMEM while staying near the HBM roofline.
    if tb is None:
        tb = _pick_tile(B, 256, 8)
    if tv is None:
        tv = _pick_tile(V, 2048, 128)
    grid = (pl.cdiv(B, tb), pl.cdiv(V, tv))

    if vmem_limit_bytes is None:
        dsz = 4  # f32
        # double-buffered: q tile, m tile, vqa tile and output tile
        need = 2 * (tb * QT + QT * tv + 2 * tb * tv) * dsz
        vmem_limit_bytes = int(min(max(2 * need, 16 << 20), 48 << 20))

    cost = pl.CostEstimate(
        flops=2 * B * QT * V,
        transcendentals=B * QT,
        bytes_accessed=4 * (B * QT + QT * V + 2 * B * V),
    )

    return pl.pallas_call(
        onehot_kernel,
        out_shape=jax.ShapeDtypeStruct((B, V), vqa_output.dtype),
        grid_spec=pltpu.PrefetchScalarGridSpec(
            num_scalar_prefetch=0,
            grid=grid,
            in_specs=[
                pl.BlockSpec((tb, QT), lambda i, j: (i, 0)),   # softmax input
                pl.BlockSpec((QT, tv), lambda i, j: (0, j)),   # one-hot matrix
                pl.BlockSpec((tb, tv), lambda i, j: (i, j)),   # vqa gate
            ],
            out_specs=pl.BlockSpec((tb, tv), lambda i, j: (i, j)),
        ),
        compiler_params=pltpu.CompilerParams(
            dimension_semantics=("parallel", "parallel"),
            vmem_limit_bytes=vmem_limit_bytes,
        ),
        cost_estimate=cost,
    )(question_type_output, question_type_matrix, vqa_output)


def build_question_type_matrix(question_type_map_dict, ans_vocab_size,
                               question_type_output_dim):
    """Mirrors OneHotLayer.__init__: one-hot scatter of answer -> question-type."""
    m = np.zeros((question_type_output_dim, ans_vocab_size), dtype=np.float32)
    for answer_index, question_types in question_type_map_dict.items():
        answer_index = int(answer_index)
        for question_type in question_types:
            m[question_type, answer_index] = 1.0
    return jnp.asarray(m)


def _reference(q, m, v):
    return (jax.nn.softmax(q, axis=-1) @ m) * v


if __name__ == "__main__":
    # Small, module-consistent shapes.
    B = 8     # batch
    QT = 16   # question_type_output_dim
    V = 128   # ans_vocab_size

    # Deterministic synthetic question_type_map_dict:
    # each answer index maps to one (or two) question types.
    question_type_map_dict = {
        str(a): [a % QT] + ([(a + 3) % QT] if a % 5 == 0 else [])
        for a in range(V)
    }
    qt_matrix = build_question_type_matrix(question_type_map_dict, V, QT)

    key = jax.random.PRNGKey(0)
    k1, k2 = jax.random.split(key)
    question_type_output = jax.random.normal(k1, (B, QT), dtype=jnp.float32)
    vqa_output = jax.random.normal(k2, (B, V), dtype=jnp.float32)

    # Single-tile path (demo shapes fit one block).
    out = onehot_layer(question_type_output, qt_matrix, vqa_output)
    out = jax.block_until_ready(out)
    ref = _reference(question_type_output, qt_matrix, vqa_output)
    assert out.shape == (B, V)
    # approx=True reciprocal -> allow ~1e-3-level relative error.
    assert jnp.allclose(out, ref, atol=5e-3, rtol=5e-3), "mismatch vs reference (1 tile)"

    # Multi-tile path: same math, forced small tiles to exercise the 2-D grid.
    B2, V2 = 24, 384
    qmap2 = {str(a): [a % QT] for a in range(V2)}
    qt_matrix2 = build_question_type_matrix(qmap2, V2, QT)
    k3, k4 = jax.random.split(k2)
    q2 = jax.random.normal(k3, (B2, QT), dtype=jnp.float32)
    v2 = jax.random.normal(k4, (B2, V2), dtype=jnp.float32)
    out2 = jax.block_until_ready(
        onehot_layer(q2, qt_matrix2, v2, tb=8, tv=128))  # grid = (3, 3)
    ref2 = _reference(q2, qt_matrix2, v2)
    assert jnp.allclose(out2, ref2, atol=5e-3, rtol=5e-3), "mismatch vs reference (tiled)"

    print("KERNEL_OK")
</pallas_src>

<mosaic_0001>
module attributes {stable_mosaic.version = 11 : i64} {
  func.func @onehot_kernel(%arg0: i32, %arg1: i32, %arg2: memref<8x16xf32, #tpu.memory_space<vmem>>, %arg3: memref<16x128xf32, #tpu.memory_space<vmem>>, %arg4: memref<8x128xf32, #tpu.memory_space<vmem>>, %arg5: memref<8x128xf32, #tpu.memory_space<vmem>>) attributes {dimension_semantics = [#tpu.dimension_semantics<parallel>, #tpu.dimension_semantics<parallel>], iteration_bounds = array<i64: 1, 1>, scalar_prefetch = 0 : i64, scratch_operands = 0 : i64, tpu.core_type = #tpu.core_type<tc>, window_params = [{transform_indices = @transform_0, window_bounds = array<i64: 8, 16>}, {transform_indices = @transform_1, window_bounds = array<i64: 16, 128>}, {transform_indices = @transform_2, window_bounds = array<i64: 8, 128>}, {transform_indices = @transform_3, window_bounds = array<i64: 8, 128>}]} {
    %c0 = arith.constant 0 : index
    %c0_0 = arith.constant 0 : index
    %0 = vector.load %arg2[%c0, %c0_0] : memref<8x16xf32, #tpu.memory_space<vmem>>, vector<8x16xf32>
    %cst = arith.constant dense<0xFF800000> : vector<8xf32>
    %1 = vector.multi_reduction <maximumf>, %0, %cst [1] : vector<8x16xf32> to vector<8xf32>
    %2 = vector.shape_cast %1 : vector<8xf32> to vector<8x1xf32>
    %3 = vector.broadcast %2 : vector<8x1xf32> to vector<8x16xf32>
    %4 = arith.subf %0, %3 : vector<8x16xf32>
    %5 = math.exp %4 : vector<8x16xf32>
    %cst_1 = arith.constant dense<0.000000e+00> : vector<8xf32>
    %6 = vector.multi_reduction <add>, %5, %cst_1 [1] : vector<8x16xf32> to vector<8xf32>
    %7 = vector.shape_cast %6 : vector<8xf32> to vector<8x1xf32>
    %8 = tpu.reciprocal %7 {approx = true} : vector<8x1xf32> -> vector<8x1xf32>
    %c0_2 = arith.constant 0 : index
    %c0_3 = arith.constant 0 : index
    %9 = vector.load %arg3[%c0_2, %c0_3] : memref<16x128xf32, #tpu.memory_space<vmem>>, vector<16x128xf32>
    %cst_4 = arith.constant dense<0.000000e+00> : vector<8x128xf32>
    %10 = tpu.matmul %5, %9, %cst_4 {dimension_numbers = #tpu.dot_dimension_numbers<[1], [0], [0], [1], [0, 0, 1, 1], [], []>} : vector<8x16xf32>, vector<16x128xf32>, vector<8x128xf32> -> vector<8x128xf32>
    %11 = vector.broadcast %8 : vector<8x1xf32> to vector<8x128xf32>
    %12 = arith.mulf %10, %11 : vector<8x128xf32>
    %c0_5 = arith.constant 0 : index
    %c0_6 = arith.constant 0 : index
    %13 = vector.load %arg4[%c0_5, %c0_6] : memref<8x128xf32, #tpu.memory_space<vmem>>, vector<8x128xf32>
    %14 = arith.mulf %12, %13 : vector<8x128xf32>
    %c0_7 = arith.constant 0 : index
    %c0_8 = arith.constant 0 : index
    %15 = vector.load %arg5[%c0_7, %c0_8] : memref<8x128xf32, #tpu.memory_space<vmem>>, vector<8x128xf32>
    tpu.vector_store %arg5[%c0_7, %c0_8], %14 {strides = array<i32>} : memref<8x128xf32, #tpu.memory_space<vmem>>, vector<8x128xf32>,
    return
  }
  func.func @transform_0(%arg0: i32, %arg1: i32) -> (i32, i32) {
    %c0_i32 = arith.constant 0 : i32
    %c0_i32_0 = arith.constant 0 : i32
    return %arg0, %c0_i32 : i32, i32
  }
  func.func @transform_1(%arg0: i32, %arg1: i32) -> (i32, i32) {
    %c0_i32 = arith.constant 0 : i32
    %c0_i32_0 = arith.constant 0 : i32
    return %c0_i32, %arg1 : i32, i32
  }
  func.func @transform_2(%arg0: i32, %arg1: i32) -> (i32, i32) {
    %c0_i32 = arith.constant 0 : i32
    return %arg0, %arg1 : i32, i32
  }
  func.func @transform_3(%arg0: i32, %arg1: i32) -> (i32, i32) {
    %c0_i32 = arith.constant 0 : i32
    return %arg0, %arg1 : i32, i32
  }
}

</mosaic_0001>

<bundles_post_ra>
// kernel: tpu_custom_call.1
= control target key start
LH: loop header
LB: loop body
LE: loop exit
PB: predicated region body
PF: predicated region fallthrough
CT: control target
= control target key end

     0   :  { %8 = vsyncpa [#allocation3], 0  ;;  %s360_s0 = inlined_call_operand.hbm [shape: f32[8,16], index: 0, kind: input, shape index: {}]   ;;  %s361_s1 = inlined_call_operand.hbm [shape: f32[16,128], index: 1, kind: input, shape index: {}]   ;;  %s362_s2 = inlined_call_operand.hbm [shape: f32[8,128], index: 2, kind: input, shape index: {}]   ;;  %s363_s3 = inlined_call_operand.hbm [shape: f32[8,128], index: 3, kind: output, shape index: {}]  }
   0x1   :  { %9 = vsyncpa [#allocation6], 0 }
   0x2   :  { %10 = vsyncpa [#allocation4], 0  ;;  %s280_s12 = smov [#allocation5]   ;;  %s186_s16 = scalar_lea.hbm %s361_s1, 256 }
   0x3   :  { %s26_s13 = sshll.u32 %s280_s12, 4  ;;  %p187_p0 = scmp.ne.s32.totalorder %s361_s1, %s186_s16  ;;  %s27_s13 = int_to_ptr.vmem [resolvable:$true] %s26_s13 }
   0x4   :  { %p190_p1 = scmp.lt.u32.totalorder %s186_s16, %s361_s1 }
   0x6   :  { %p192_p2 = pnand %p190_p1, %p187_p0 }
   0x8   :  { %195 = shalt.err (!%p192_p2)
}
   0x9   :  { %s196_s21 = scalar_lea.vmem %s27_s13, 256  ;;  %p201_p4 = scmp.lt.s32.totalorder %s27_s13, %s27_s13 }
   0xa   :  { %p197_p3 = scmp.ne.s32.totalorder %s27_s13, %s196_s21  ;;  %p202_p5 = scmp.lt.s32.totalorder %s196_s21, %s196_s21 }
   0xc   :  { %p203_p6 = por %p202_p5, %p201_p4 }
   0xe   :  { %p204_p7 = pnand %p203_p6, %p197_p3 }
  0x10   :  { %207 = shalt.err (!%p204_p7)
}
  0x11   :  { %s281_s22 = smov 128   ;;  %s282_s23 = smov 8  }
  0x12   :  { %32 = dma.hbm_to_vmem [thread:$0]  %s361_s1, 256, %s27_s13, [#allocation6], %s281_s22, %s281_s22, %s282_s23  }
  0x13   :  { %s283_s26 = smov [#allocation2]   ;;  %s284_s28 = smov [#allocation7]  }
  0x14   :  { %s17_s27 = sshll.u32 %s283_s26, 4  ;;  %s39_s29 = sshll.u32 %s284_s28, 4  ;;  %s18_s27 = int_to_ptr.vmem [resolvable:$true] %s17_s27  ;;  %s40_s29 = int_to_ptr.vmem [resolvable:$true] %s39_s29 }
  0x15   :  { %s208_s5 = scalar_lea.hbm %s360_s0, 128 }
  0x16   :  { %p209_p8 = scmp.ne.s32.totalorder %s360_s0, %s208_s5  ;;  %p212_p9 = scmp.lt.u32.totalorder %s208_s5, %s360_s0 }
  0x18   :  { %p214_p10 = pnand %p212_p9, %p209_p8 }
  0x1a   :  { %217 = shalt.err (!%p214_p10)
}
  0x1b   :  { %s218_s1 = scalar_lea.vmem %s18_s27, 128  ;;  %p223_p12 = scmp.lt.s32.totalorder %s18_s27, %s18_s27 }
  0x1c   :  { %p219_p11 = scmp.ne.s32.totalorder %s18_s27, %s218_s1  ;;  %p224_p13 = scmp.lt.s32.totalorder %s218_s1, %s218_s1 }
  0x1e   :  { %p225_p0 = por %p224_p13, %p223_p12 }
  0x20   :  { %p226_p1 = pnand %p225_p0, %p219_p11 }
  0x22   :  { %229 = shalt.err (!%p226_p1)
}
  0x23   :  { %20 = dma.hbm_to_vmem [thread:$0]  %s360_s0, 128, %s18_s27, [#allocation3]  }
  0x24   :  { %s230_s14 = scalar_lea.hbm %s362_s2, 128 }
  0x25   :  { %p231_p2 = scmp.ne.s32.totalorder %s362_s2, %s230_s14  ;;  %p234_p3 = scmp.lt.u32.totalorder %s230_s14, %s362_s2 }
  0x27   :  { %p236_p4 = pnand %p234_p3, %p231_p2 }
  0x29   :  { %239 = shalt.err (!%p236_p4)
}
  0x2a   :  { %s240_s19 = scalar_lea.vmem %s40_s29, 128  ;;  %p245_p6 = scmp.lt.s32.totalorder %s40_s29, %s40_s29 }
  0x2b   :  { %p241_p5 = scmp.ne.s32.totalorder %s40_s29, %s240_s19  ;;  %p246_p7 = scmp.lt.s32.totalorder %s240_s19, %s240_s19 }
  0x2d   :  { %p247_p8 = por %p246_p7, %p245_p6 }
  0x2f   :  { %p248_p9 = pnand %p247_p8, %p241_p5 }
  0x31   :  { %251 = shalt.err (!%p248_p9)
}
  0x32   :  { %42 = dma.hbm_to_vmem [thread:$0]  %s362_s2, 128, %s40_s29, [#allocation6]  }
  0x33   :  { %274 = dma.done.wait [#allocation3], 128  }
  0x34   :  { %275 = vsyncadd [#allocation3], 4294967168 }
  0x35   :  { %276 = dma.done.wait [#allocation6], 384  }
  0x36   :  { %277 = vsyncadd [#allocation6], 4294966912  ;;  %vm53_vm0 = vcmask 130048   ;;  %v52_v0 = vld [vmem:[#allocation2] sm:$0xff]  ;;  %v64_v2 = vld [vmem:[#allocation5] sm:$0xff]  ;;  %v285_v4 = vmov 0.0|0.0  }
  0x37   :  { %v54_v1 = vsel %vm53_vm0, %v52_v0, -inf  ;;  %v65_v3 = vld [vmem:[#allocation5 + $0x8] sm:$0xff]  ;;  %170 = vmatprep.subr.bf16.mxu0 %v285_v4  ;;  %vm286_vm1 = vmmov 0   ;;  %v287_v6 = vmov 0.0   ;;  %v140_v15 = vld [vmem:[#allocation7] sm:$0xff]  ;;  %s288_s2 = smov [#allocation8]  }
  0x38   :  { %55 = vmax.xlane.f32.xlu0 %v54_v1  ;;  %v171_v5 = vpack.c.bf16 %v65_v3, %v64_v2  ;;  %167 = vmatprep.mubr.msk.f32.mxu0 %vm286_vm1, %v287_v6  ;;  %s149_s21 = sshll.u32 %s288_s2, 4  ;;  %s150_s21 = int_to_ptr.vmem [resolvable:$true] %s149_s21 }
  0x39   :  { %s252_s22 = scalar_lea.vmem %s150_s21, 128  ;;  %p257_p11 = scmp.lt.s32.totalorder %s150_s21, %s150_s21 }
  0x3a   :  { %172 = vmatpush3.bf16.msra.mxu0 %v171_v5  ;;  %p253_p10 = scmp.ne.s32.totalorder %s150_s21, %s252_s22  ;;  %p258_p12 = scmp.lt.s32.totalorder %s252_s22, %s252_s22 }
  0x3c   :  { %p259_p13 = por %p258_p12, %p257_p11 }
  0x3e   :  { %p260_p0 = pnand %p259_p13, %p253_p10 }
  0xc5   :  { %v56_v7 = vpop.xlane.xlu0 %55 }
  0xc6   :  { %v57_v8 = vsub.f32 %v52_v0, %v56_v7 }
  0xc8   :  { %v58_v9 = vmul.f32 1.442695, %v57_v8 }
  0xca   :  { %182 = vpow2.f32 %v58_v9 }
  0xd4   :  { %v183_v10 = vpop.eup %182 }
  0xd5   :  { %168 = vmatmul.mubr.msk.f32.vlgmr.msra.gmra.mrb[0].mxu0 %vm53_vm0, %v183_v10  ;;  %v60_v11 = vsel %vm53_vm0, %v183_v10, 0.0 }
  0xd6   :  { %61 = vadd.xlane.f32.xlu0 %v60_v11 }
 0x163   :  { %v62_v12 = vpop.xlane.xlu0 %61 }
 0x164   :  { %184 = vrcp.f32 %v62_v12 }
 0x16e   :  { %v185_v13 = vpop.eup %184 }
 0x1a8   :  { %v135_v14 = vpop.f32.mrb[0].mxu0 }
 0x1a9   :  { %v139_v16 = vmul.f32 %v185_v13, %v135_v14  ;;  %v169_v17 = vpop.f32.mrb[1].mxu0 }
 0x1ab   :  { %v141_v18 = vmul.f32 %v140_v15, %v139_v16 }
 0x1ad   :  { %142 = vst [vmem:[#allocation8] sm:$0xff] %v141_v18 }
 0x1ae   :  { %263 = shalt.err (!%p260_p0)
}
 0x1af   :  { %s264_s25 = scalar_lea.hbm %s363_s3, 128 }
 0x1b0   :  { %p265_p1 = scmp.ne.s32.totalorder %s363_s3, %s264_s25  ;;  %p268_p2 = scmp.lt.u32.totalorder %s264_s25, %s363_s3 }
 0x1b2   :  { %p270_p3 = pnand %p268_p2, %p265_p1 }
 0x1b4   :  { %273 = shalt.err (!%p270_p3)
}
 0x1b5   :  { %152 = dma.vmem_to_hbm [thread:$0]  %s150_s21, 128, %s363_s3, [#allocation4]  }
 0x1b6   :  { %278 = dma.done.wait [#allocation4], 128  }
 0x1b7   :  { %279 = vsyncadd [#allocation4], 4294967168 }
 0x1b8   :  { %156 = vsyncpa [#allocation3], 1 }
 0x1b9   :  { %157 = vsyncpa [#allocation6], 1 }
 0x1ba   :  { %158 = vsyncpa [#allocation4], 1 }

</bundles_post_ra>
